<compile_context>
chip_gen: v7x
topology: tpu7x:2x2x1
jax: 0.10.0
libtpu: 0.0.40
codegen_flags: <defaults>
</compile_context>

<pallas_src>
import functools

import jax
import jax.numpy as jnp
from jax.experimental import pallas as pl
from jax.experimental.pallas import tpu as pltpu

NUM_REWARD_FEATS = 4           # F
NAME_EMB = 32                  # feature name embedding size
IND_EMB = 32                   # indicator embedding size
HIDDEN = 128
PER_FEAT_OUT = 64


def _round_up(x, m):
    return (x + m - 1) // m * m


def _encoder_kernel(opts_ref, c_ref, d_ref, w1f_ref, w2_ref, b2_ref, o_ref):
    """One grid step == one tile of Mt rows, all F features fused.

    opts_ref : [Mt, 2F]   feature values (cols 0:F) || indicator bits (cols F:2F)
    c_ref    : [F, H]     folded layer-1 constant  (name@W1n + ind0@W1i + b1)
    d_ref    : [F, H]     folded indicator delta   ((ind1-ind0)@W1i)
    w1f_ref  : [F, H]     layer-1 row for the scalar feature value
    w2_ref   : [F, H, O]  layer-2 weights
    b2_ref   : [F, O]     layer-2 bias
    o_ref    : [Mt, F*O]  lane-dense output slab (feature-major column blocks)
    """
    opts = opts_ref[...]                                   # [Mt, 2F]
    c = c_ref[...]                                         # [F, H]
    d = d_ref[...]                                         # [F, H]
    w1f = w1f_ref[...]                                     # [F, H]
    b2 = b2_ref[...]                                       # [F, O]

    outs = []
    for i in range(NUM_REWARD_FEATS):                      # static unroll, F=4
        fv = opts[:, i][:, None]                           # [Mt, 1] feature value
        iv = opts[:, NUM_REWARD_FEATS + i][:, None]        # [Mt, 1] indicator bit
        # Layer 1 (folded): two rank-1 FMAs + bias + relu  -> [Mt, H]  (VPU)
        h = jnp.maximum(fv * w1f[i][None, :] + iv * d[i][None, :] + c[i][None, :],
                        0.0)
        # Layer 2: [Mt, H] @ [H, O]  -> [Mt, O]  (MXU, f32 accumulate)
        out_i = (jnp.dot(h, w2_ref[i], preferred_element_type=jnp.float32)
                 + b2[i][None, :])
        outs.append(out_i)

    # Single unmasked 256-lane-wide store.
    o_ref[...] = jnp.concatenate(outs, axis=-1).astype(o_ref.dtype)


@functools.partial(jax.jit,
                   static_argnames=("batch_size", "num_options", "tile_m"))
def localized_option_encoder_forward(options, params, *, batch_size,
                                     num_options, tile_m=512):
    F = NUM_REWARD_FEATS
    M = batch_size * num_options

    # ---- glue: flatten inputs to one compact [M, 2F] slab ---------------------
    opts2d = options[..., :2 * F].reshape(M, 2 * F).astype(jnp.float32)

    # M tiling: multiple of 8 sublanes, pad the ragged tail with zero rows.
    Mt = min(tile_m, _round_up(M, 8))
    M_pad = _round_up(M, Mt)
    if M_pad != M:
        opts2d = jnp.pad(opts2d, ((0, M_pad - M), (0, 0)))

    # ---- glue: fold layer-1 constants (tiny, O(F*H) work) ---------------------
    name_emb = params["name_emb"]                           # [F, NAME_EMB]
    ind0 = params["ind_table"][0]                           # [IND_EMB]
    ind1 = params["ind_table"][1]                           # [IND_EMB]
    w1n, w1f, w1i = params["w1n"], params["w1f"], params["w1i"]
    b1, w2, b2 = params["b1"], params["w2"], params["b2"]

    c = (jnp.einsum("fn,fnh->fh", name_emb, w1n)
         + jnp.einsum("k,fkh->fh", ind0, w1i) + b1)         # [F, H]
    d = jnp.einsum("k,fkh->fh", ind1 - ind0, w1i)           # [F, H]

    grid = (M_pad // Mt,)
    out = pl.pallas_call(
        _encoder_kernel,
        out_shape=jax.ShapeDtypeStruct((M_pad, F * PER_FEAT_OUT), jnp.float32),
        grid_spec=pltpu.PrefetchScalarGridSpec(
            num_scalar_prefetch=0,
            grid=grid,
            in_specs=[
                pl.BlockSpec((Mt, 2 * F), lambda m: (m, 0)),              # options
                pl.BlockSpec((F, HIDDEN), lambda m: (0, 0)),              # c
                pl.BlockSpec((F, HIDDEN), lambda m: (0, 0)),              # d
                pl.BlockSpec((F, HIDDEN), lambda m: (0, 0)),              # w1f
                pl.BlockSpec((F, HIDDEN, PER_FEAT_OUT), lambda m: (0, 0, 0)),  # w2
                pl.BlockSpec((F, PER_FEAT_OUT), lambda m: (0, 0)),        # b2
            ],
            out_specs=pl.BlockSpec((Mt, F * PER_FEAT_OUT), lambda m: (m, 0)),
        ),
        compiler_params=pltpu.CompilerParams(
            dimension_semantics=("parallel",)),
    )(opts2d, c, d, w1f, w2, b2)

    # [M_pad, F*OUT] -> [B, num_options, F, OUT]  (feature-major column blocks,
    # matching torch.stack(..., dim=-2)); slice off pad rows, reshape is free.
    out = out[:M].reshape(batch_size, num_options, F, PER_FEAT_OUT)
    return out


def make_params(key):
    """Deterministic synthetic parameters (same shapes as the PyTorch module)."""
    ks = jax.random.split(key, 8)
    F = NUM_REWARD_FEATS
    params = {
        # FeatureNameEmbeddings.name_embeddings.weight: [F, 32]
        "name_emb": jax.random.normal(ks[0], (F, NAME_EMB), jnp.float32) * 0.1,
        # indicator_embeddings.weight: [8, 32]; only rows 0/1 are used (MAX_REWARD).
        "ind_table": jax.random.normal(ks[1], (8, IND_EMB), jnp.float32) * 0.1,
        # input_fcs[i]: Linear(65,128) stored pre-split as (name | value | indicator)
        # blocks in [in, out] layout, plus Linear(128,64).
        "w1n": jax.random.normal(ks[2], (F, NAME_EMB, HIDDEN), jnp.float32) * 0.1,
        "w1f": jax.random.normal(ks[3], (F, HIDDEN), jnp.float32) * 0.1,
        "w1i": jax.random.normal(ks[4], (F, IND_EMB, HIDDEN), jnp.float32) * 0.1,
        "b1": jax.random.normal(ks[5], (F, HIDDEN), jnp.float32) * 0.1,
        "w2": jax.random.normal(ks[6], (F, HIDDEN, PER_FEAT_OUT), jnp.float32) * 0.1,
        "b2": jax.random.normal(ks[7], (F, PER_FEAT_OUT), jnp.float32) * 0.1,
    }
    return params


def reference_forward(options, params):
    """Pure-JAX mirror of the PyTorch forward (eval mode)."""
    F = NUM_REWARD_FEATS
    B, O, _ = options.shape
    fv = options[..., :F]                                   # [B,O,F]
    iv = options[..., F:2 * F].astype(jnp.int32)            # [B,O,F] in {0,1}
    name = jnp.broadcast_to(params["name_emb"], (B, O, F, NAME_EMB))
    ind = params["ind_table"][2 * 0 + iv]                   # [B,O,F,IND_EMB]
    x = jnp.concatenate([name, fv[..., None], ind], axis=-1)  # [B,O,F,65]
    outs = []
    for i in range(F):
        w1 = jnp.concatenate(
            [params["w1n"][i], params["w1f"][i][None, :], params["w1i"][i]], axis=0)
        h = jnp.maximum(x[..., i, :] @ w1 + params["b1"][i], 0.0)
        outs.append(h @ params["w2"][i] + params["b2"][i])
    return jnp.stack(outs, axis=-2)


if __name__ == "__main__":
    key = jax.random.PRNGKey(0)
    k_params, k_feat, k_ind = jax.random.split(key, 3)

    batch_size, num_options = 2, 8
    F = NUM_REWARD_FEATS

    params = make_params(k_params)

    feat_vals = jax.random.normal(k_feat, (batch_size, num_options, F), jnp.float32)
    ind_bits = jax.random.bernoulli(k_ind, 0.5,
                                    (batch_size, num_options, F)).astype(jnp.float32)
    options = jnp.concatenate([feat_vals, ind_bits], axis=-1)   # [2, 8, 8]

    out = localized_option_encoder_forward(
        options, params, batch_size=batch_size, num_options=num_options)
    out = jax.block_until_ready(out)

    ref = reference_forward(options, params)
    assert out.shape == (batch_size, num_options, F, PER_FEAT_OUT), out.shape
    assert jnp.allclose(out, ref, rtol=1e-5, atol=1e-5), float(jnp.max(jnp.abs(out - ref)))

    print("KERNEL_OK")
</pallas_src>

<mosaic_0001>
module attributes {stable_mosaic.version = 11 : i64} {
  func.func @_encoder_kernel(%arg0: i32, %arg1: memref<16x8xf32, #tpu.memory_space<vmem>>, %arg2: memref<4x128xf32, #tpu.memory_space<vmem>>, %arg3: memref<4x128xf32, #tpu.memory_space<vmem>>, %arg4: memref<4x128xf32, #tpu.memory_space<vmem>>, %arg5: memref<4x128x64xf32, #tpu.memory_space<vmem>>, %arg6: memref<4x64xf32, #tpu.memory_space<vmem>>, %arg7: memref<16x256xf32, #tpu.memory_space<vmem>>) attributes {dimension_semantics = [#tpu.dimension_semantics<parallel>], iteration_bounds = array<i64: 1>, scalar_prefetch = 0 : i64, scratch_operands = 0 : i64, tpu.core_type = #tpu.core_type<tc>, window_params = [{transform_indices = @transform_0, window_bounds = array<i64: 16, 8>}, {pipeline_mode = #tpu.pipeline_mode<synchronous>, transform_indices = @transform_1, window_bounds = array<i64: 4, 128>}, {pipeline_mode = #tpu.pipeline_mode<synchronous>, transform_indices = @transform_2, window_bounds = array<i64: 4, 128>}, {pipeline_mode = #tpu.pipeline_mode<synchronous>, transform_indices = @transform_3, window_bounds = array<i64: 4, 128>}, {pipeline_mode = #tpu.pipeline_mode<synchronous>, transform_indices = @transform_4, window_bounds = array<i64: 4, 128, 64>}, {pipeline_mode = #tpu.pipeline_mode<synchronous>, transform_indices = @transform_5, window_bounds = array<i64: 4, 64>}, {transform_indices = @transform_6, window_bounds = array<i64: 16, 256>}]} {
    %c0 = arith.constant 0 : index
    %c0_0 = arith.constant 0 : index
    %0 = vector.load %arg1[%c0, %c0_0] : memref<16x8xf32, #tpu.memory_space<vmem>>, vector<16x8xf32>
    %c0_1 = arith.constant 0 : index
    %c0_2 = arith.constant 0 : index
    %1 = vector.load %arg2[%c0_1, %c0_2] : memref<4x128xf32, #tpu.memory_space<vmem>>, vector<4x128xf32>
    %c0_3 = arith.constant 0 : index
    %c0_4 = arith.constant 0 : index
    %2 = vector.load %arg3[%c0_3, %c0_4] : memref<4x128xf32, #tpu.memory_space<vmem>>, vector<4x128xf32>
    %c0_5 = arith.constant 0 : index
    %c0_6 = arith.constant 0 : index
    %3 = vector.load %arg4[%c0_5, %c0_6] : memref<4x128xf32, #tpu.memory_space<vmem>>, vector<4x128xf32>
    %c0_7 = arith.constant 0 : index
    %c0_8 = arith.constant 0 : index
    %4 = vector.load %arg6[%c0_7, %c0_8] : memref<4x64xf32, #tpu.memory_space<vmem>>, vector<4x64xf32>
    %5 = vector.extract_strided_slice %0 {offsets = [0, 0], sizes = [16, 1], strides = [1, 1]} : vector<16x8xf32> to vector<16x1xf32>
    %6 = vector.shape_cast %5 : vector<16x1xf32> to vector<16xf32>
    %7 = vector.shape_cast %6 : vector<16xf32> to vector<16x1xf32>
    %8 = vector.extract_strided_slice %0 {offsets = [0, 4], sizes = [16, 1], strides = [1, 1]} : vector<16x8xf32> to vector<16x1xf32>
    %9 = vector.shape_cast %8 : vector<16x1xf32> to vector<16xf32>
    %10 = vector.shape_cast %9 : vector<16xf32> to vector<16x1xf32>
    %11 = vector.extract_strided_slice %3 {offsets = [0, 0], sizes = [1, 128], strides = [1, 1]} : vector<4x128xf32> to vector<1x128xf32>
    %12 = vector.shape_cast %11 : vector<1x128xf32> to vector<128xf32>
    %13 = vector.shape_cast %12 : vector<128xf32> to vector<1x128xf32>
    %14 = vector.broadcast %7 : vector<16x1xf32> to vector<16x128xf32>
    %15 = vector.broadcast %13 : vector<1x128xf32> to vector<16x128xf32>
    %16 = arith.mulf %14, %15 : vector<16x128xf32>
    %17 = vector.extract_strided_slice %2 {offsets = [0, 0], sizes = [1, 128], strides = [1, 1]} : vector<4x128xf32> to vector<1x128xf32>
    %18 = vector.shape_cast %17 : vector<1x128xf32> to vector<128xf32>
    %19 = vector.shape_cast %18 : vector<128xf32> to vector<1x128xf32>
    %20 = vector.broadcast %10 : vector<16x1xf32> to vector<16x128xf32>
    %21 = vector.broadcast %19 : vector<1x128xf32> to vector<16x128xf32>
    %22 = arith.mulf %20, %21 : vector<16x128xf32>
    %23 = arith.addf %16, %22 : vector<16x128xf32>
    %24 = vector.extract_strided_slice %1 {offsets = [0, 0], sizes = [1, 128], strides = [1, 1]} : vector<4x128xf32> to vector<1x128xf32>
    %25 = vector.shape_cast %24 : vector<1x128xf32> to vector<128xf32>
    %26 = vector.shape_cast %25 : vector<128xf32> to vector<1x128xf32>
    %27 = vector.broadcast %26 : vector<1x128xf32> to vector<16x128xf32>
    %28 = arith.addf %23, %27 : vector<16x128xf32>
    %cst = arith.constant 0.000000e+00 : f32
    %29 = vector.broadcast %cst : f32 to vector<16x128xf32>
    %30 = arith.maximumf %28, %29 : vector<16x128xf32>
    %c0_9 = arith.constant 0 : index
    %c0_10 = arith.constant 0 : index
    %c0_11 = arith.constant 0 : index
    %31 = vector.load %arg5[%c0_9, %c0_10, %c0_11] : memref<4x128x64xf32, #tpu.memory_space<vmem>>, vector<1x128x64xf32>
    %32 = vector.shape_cast %31 : vector<1x128x64xf32> to vector<128x64xf32>
    %cst_12 = arith.constant dense<0.000000e+00> : vector<16x64xf32>
    %33 = tpu.matmul %30, %32, %cst_12 {dimension_numbers = #tpu.dot_dimension_numbers<[1], [0], [0], [1], [0, 0, 1, 1], [], []>} : vector<16x128xf32>, vector<128x64xf32>, vector<16x64xf32> -> vector<16x64xf32>
    %34 = vector.extract_strided_slice %4 {offsets = [0, 0], sizes = [1, 64], strides = [1, 1]} : vector<4x64xf32> to vector<1x64xf32>
    %35 = vector.shape_cast %34 : vector<1x64xf32> to vector<64xf32>
    %36 = vector.shape_cast %35 : vector<64xf32> to vector<1x64xf32>
    %37 = vector.broadcast %36 : vector<1x64xf32> to vector<16x64xf32>
    %38 = arith.addf %33, %37 : vector<16x64xf32>
    %39 = vector.extract_strided_slice %0 {offsets = [0, 1], sizes = [16, 1], strides = [1, 1]} : vector<16x8xf32> to vector<16x1xf32>
    %40 = vector.shape_cast %39 : vector<16x1xf32> to vector<16xf32>
    %41 = vector.shape_cast %40 : vector<16xf32> to vector<16x1xf32>
    %42 = vector.extract_strided_slice %0 {offsets = [0, 5], sizes = [16, 1], strides = [1, 1]} : vector<16x8xf32> to vector<16x1xf32>
    %43 = vector.shape_cast %42 : vector<16x1xf32> to vector<16xf32>
    %44 = vector.shape_cast %43 : vector<16xf32> to vector<16x1xf32>
    %45 = vector.extract_strided_slice %3 {offsets = [1, 0], sizes = [1, 128], strides = [1, 1]} : vector<4x128xf32> to vector<1x128xf32>
    %46 = vector.shape_cast %45 : vector<1x128xf32> to vector<128xf32>
    %47 = vector.shape_cast %46 : vector<128xf32> to vector<1x128xf32>
    %48 = vector.broadcast %41 : vector<16x1xf32> to vector<16x128xf32>
    %49 = vector.broadcast %47 : vector<1x128xf32> to vector<16x128xf32>
    %50 = arith.mulf %48, %49 : vector<16x128xf32>
    %51 = vector.extract_strided_slice %2 {offsets = [1, 0], sizes = [1, 128], strides = [1, 1]} : vector<4x128xf32> to vector<1x128xf32>
    %52 = vector.shape_cast %51 : vector<1x128xf32> to vector<128xf32>
    %53 = vector.shape_cast %52 : vector<128xf32> to vector<1x128xf32>
    %54 = vector.broadcast %44 : vector<16x1xf32> to vector<16x128xf32>
    %55 = vector.broadcast %53 : vector<1x128xf32> to vector<16x128xf32>
    %56 = arith.mulf %54, %55 : vector<16x128xf32>
    %57 = arith.addf %50, %56 : vector<16x128xf32>
    %58 = vector.extract_strided_slice %1 {offsets = [1, 0], sizes = [1, 128], strides = [1, 1]} : vector<4x128xf32> to vector<1x128xf32>
    %59 = vector.shape_cast %58 : vector<1x128xf32> to vector<128xf32>
    %60 = vector.shape_cast %59 : vector<128xf32> to vector<1x128xf32>
    %61 = vector.broadcast %60 : vector<1x128xf32> to vector<16x128xf32>
    %62 = arith.addf %57, %61 : vector<16x128xf32>
    %cst_13 = arith.constant 0.000000e+00 : f32
    %63 = vector.broadcast %cst_13 : f32 to vector<16x128xf32>
    %64 = arith.maximumf %62, %63 : vector<16x128xf32>
    %c1 = arith.constant 1 : index
    %c0_14 = arith.constant 0 : index
    %c0_15 = arith.constant 0 : index
    %65 = vector.load %arg5[%c1, %c0_14, %c0_15] : memref<4x128x64xf32, #tpu.memory_space<vmem>>, vector<1x128x64xf32>
    %66 = vector.shape_cast %65 : vector<1x128x64xf32> to vector<128x64xf32>
    %cst_16 = arith.constant dense<0.000000e+00> : vector<16x64xf32>
    %67 = tpu.matmul %64, %66, %cst_16 {dimension_numbers = #tpu.dot_dimension_numbers<[1], [0], [0], [1], [0, 0, 1, 1], [], []>} : vector<16x128xf32>, vector<128x64xf32>, vector<16x64xf32> -> vector<16x64xf32>
    %68 = vector.extract_strided_slice %4 {offsets = [1, 0], sizes = [1, 64], strides = [1, 1]} : vector<4x64xf32> to vector<1x64xf32>
    %69 = vector.shape_cast %68 : vector<1x64xf32> to vector<64xf32>
    %70 = vector.shape_cast %69 : vector<64xf32> to vector<1x64xf32>
    %71 = vector.broadcast %70 : vector<1x64xf32> to vector<16x64xf32>
    %72 = arith.addf %67, %71 : vector<16x64xf32>
    %73 = vector.extract_strided_slice %0 {offsets = [0, 2], sizes = [16, 1], strides = [1, 1]} : vector<16x8xf32> to vector<16x1xf32>
    %74 = vector.shape_cast %73 : vector<16x1xf32> to vector<16xf32>
    %75 = vector.shape_cast %74 : vector<16xf32> to vector<16x1xf32>
    %76 = vector.extract_strided_slice %0 {offsets = [0, 6], sizes = [16, 1], strides = [1, 1]} : vector<16x8xf32> to vector<16x1xf32>
    %77 = vector.shape_cast %76 : vector<16x1xf32> to vector<16xf32>
    %78 = vector.shape_cast %77 : vector<16xf32> to vector<16x1xf32>
    %79 = vector.extract_strided_slice %3 {offsets = [2, 0], sizes = [1, 128], strides = [1, 1]} : vector<4x128xf32> to vector<1x128xf32>
    %80 = vector.shape_cast %79 : vector<1x128xf32> to vector<128xf32>
    %81 = vector.shape_cast %80 : vector<128xf32> to vector<1x128xf32>
    %82 = vector.broadcast %75 : vector<16x1xf32> to vector<16x128xf32>
    %83 = vector.broadcast %81 : vector<1x128xf32> to vector<16x128xf32>
    %84 = arith.mulf %82, %83 : vector<16x128xf32>
    %85 = vector.extract_strided_slice %2 {offsets = [2, 0], sizes = [1, 128], strides = [1, 1]} : vector<4x128xf32> to vector<1x128xf32>
    %86 = vector.shape_cast %85 : vector<1x128xf32> to vector<128xf32>
    %87 = vector.shape_cast %86 : vector<128xf32> to vector<1x128xf32>
    %88 = vector.broadcast %78 : vector<16x1xf32> to vector<16x128xf32>
    %89 = vector.broadcast %87 : vector<1x128xf32> to vector<16x128xf32>
    %90 = arith.mulf %88, %89 : vector<16x128xf32>
    %91 = arith.addf %84, %90 : vector<16x128xf32>
    %92 = vector.extract_strided_slice %1 {offsets = [2, 0], sizes = [1, 128], strides = [1, 1]} : vector<4x128xf32> to vector<1x128xf32>
    %93 = vector.shape_cast %92 : vector<1x128xf32> to vector<128xf32>
    %94 = vector.shape_cast %93 : vector<128xf32> to vector<1x128xf32>
    %95 = vector.broadcast %94 : vector<1x128xf32> to vector<16x128xf32>
    %96 = arith.addf %91, %95 : vector<16x128xf32>
    %cst_17 = arith.constant 0.000000e+00 : f32
    %97 = vector.broadcast %cst_17 : f32 to vector<16x128xf32>
    %98 = arith.maximumf %96, %97 : vector<16x128xf32>
    %c2 = arith.constant 2 : index
    %c0_18 = arith.constant 0 : index
    %c0_19 = arith.constant 0 : index
    %99 = vector.load %arg5[%c2, %c0_18, %c0_19] : memref<4x128x64xf32, #tpu.memory_space<vmem>>, vector<1x128x64xf32>
    %100 = vector.shape_cast %99 : vector<1x128x64xf32> to vector<128x64xf32>
    %cst_20 = arith.constant dense<0.000000e+00> : vector<16x64xf32>
    %101 = tpu.matmul %98, %100, %cst_20 {dimension_numbers = #tpu.dot_dimension_numbers<[1], [0], [0], [1], [0, 0, 1, 1], [], []>} : vector<16x128xf32>, vector<128x64xf32>, vector<16x64xf32> -> vector<16x64xf32>
    %102 = vector.extract_strided_slice %4 {offsets = [2, 0], sizes = [1, 64], strides = [1, 1]} : vector<4x64xf32> to vector<1x64xf32>
    %103 = vector.shape_cast %102 : vector<1x64xf32> to vector<64xf32>
    %104 = vector.shape_cast %103 : vector<64xf32> to vector<1x64xf32>
    %105 = vector.broadcast %104 : vector<1x64xf32> to vector<16x64xf32>
    %106 = arith.addf %101, %105 : vector<16x64xf32>
    %107 = vector.extract_strided_slice %0 {offsets = [0, 3], sizes = [16, 1], strides = [1, 1]} : vector<16x8xf32> to vector<16x1xf32>
    %108 = vector.shape_cast %107 : vector<16x1xf32> to vector<16xf32>
    %109 = vector.shape_cast %108 : vector<16xf32> to vector<16x1xf32>
    %110 = vector.extract_strided_slice %0 {offsets = [0, 7], sizes = [16, 1], strides = [1, 1]} : vector<16x8xf32> to vector<16x1xf32>
    %111 = vector.shape_cast %110 : vector<16x1xf32> to vector<16xf32>
    %112 = vector.shape_cast %111 : vector<16xf32> to vector<16x1xf32>
    %113 = vector.extract_strided_slice %3 {offsets = [3, 0], sizes = [1, 128], strides = [1, 1]} : vector<4x128xf32> to vector<1x128xf32>
    %114 = vector.shape_cast %113 : vector<1x128xf32> to vector<128xf32>
    %115 = vector.shape_cast %114 : vector<128xf32> to vector<1x128xf32>
    %116 = vector.broadcast %109 : vector<16x1xf32> to vector<16x128xf32>
    %117 = vector.broadcast %115 : vector<1x128xf32> to vector<16x128xf32>
    %118 = arith.mulf %116, %117 : vector<16x128xf32>
    %119 = vector.extract_strided_slice %2 {offsets = [3, 0], sizes = [1, 128], strides = [1, 1]} : vector<4x128xf32> to vector<1x128xf32>
    %120 = vector.shape_cast %119 : vector<1x128xf32> to vector<128xf32>
    %121 = vector.shape_cast %120 : vector<128xf32> to vector<1x128xf32>
    %122 = vector.broadcast %112 : vector<16x1xf32> to vector<16x128xf32>
    %123 = vector.broadcast %121 : vector<1x128xf32> to vector<16x128xf32>
    %124 = arith.mulf %122, %123 : vector<16x128xf32>
    %125 = arith.addf %118, %124 : vector<16x128xf32>
    %126 = vector.extract_strided_slice %1 {offsets = [3, 0], sizes = [1, 128], strides = [1, 1]} : vector<4x128xf32> to vector<1x128xf32>
    %127 = vector.shape_cast %126 : vector<1x128xf32> to vector<128xf32>
    %128 = vector.shape_cast %127 : vector<128xf32> to vector<1x128xf32>
    %129 = vector.broadcast %128 : vector<1x128xf32> to vector<16x128xf32>
    %130 = arith.addf %125, %129 : vector<16x128xf32>
    %cst_21 = arith.constant 0.000000e+00 : f32
    %131 = vector.broadcast %cst_21 : f32 to vector<16x128xf32>
    %132 = arith.maximumf %130, %131 : vector<16x128xf32>
    %c3 = arith.constant 3 : index
    %c0_22 = arith.constant 0 : index
    %c0_23 = arith.constant 0 : index
    %133 = vector.load %arg5[%c3, %c0_22, %c0_23] : memref<4x128x64xf32, #tpu.memory_space<vmem>>, vector<1x128x64xf32>
    %134 = vector.shape_cast %133 : vector<1x128x64xf32> to vector<128x64xf32>
    %cst_24 = arith.constant dense<0.000000e+00> : vector<16x64xf32>
    %135 = tpu.matmul %132, %134, %cst_24 {dimension_numbers = #tpu.dot_dimension_numbers<[1], [0], [0], [1], [0, 0, 1, 1], [], []>} : vector<16x128xf32>, vector<128x64xf32>, vector<16x64xf32> -> vector<16x64xf32>
    %136 = vector.extract_strided_slice %4 {offsets = [3, 0], sizes = [1, 64], strides = [1, 1]} : vector<4x64xf32> to vector<1x64xf32>
    %137 = vector.shape_cast %136 : vector<1x64xf32> to vector<64xf32>
    %138 = vector.shape_cast %137 : vector<64xf32> to vector<1x64xf32>
    %139 = vector.broadcast %138 : vector<1x64xf32> to vector<16x64xf32>
    %140 = arith.addf %135, %139 : vector<16x64xf32>
    %141 = tpu.concatenate %38, %72, %106, %140 in 1 : vector<16x64xf32>, vector<16x64xf32>, vector<16x64xf32>, vector<16x64xf32> -> vector<16x256xf32>
    %c0_25 = arith.constant 0 : index
    %c0_26 = arith.constant 0 : index
    %142 = vector.load %arg7[%c0_25, %c0_26] : memref<16x256xf32, #tpu.memory_space<vmem>>, vector<16x256xf32>
    tpu.vector_store %arg7[%c0_25, %c0_26], %141 {strides = array<i32>} : memref<16x256xf32, #tpu.memory_space<vmem>>, vector<16x256xf32>,
    return
  }
  func.func @transform_0(%arg0: i32) -> (i32, i32) {
    %c0_i32 = arith.constant 0 : i32
    %c0_i32_0 = arith.constant 0 : i32
    return %arg0, %c0_i32 : i32, i32
  }
  func.func @transform_1(%arg0: i32) -> (i32, i32) {
    %c0_i32 = arith.constant 0 : i32
    %c0_i32_0 = arith.constant 0 : i32
    %c0_i32_1 = arith.constant 0 : i32
    return %c0_i32, %c0_i32_0 : i32, i32
  }
  func.func @transform_2(%arg0: i32) -> (i32, i32) {
    %c0_i32 = arith.constant 0 : i32
    %c0_i32_0 = arith.constant 0 : i32
    %c0_i32_1 = arith.constant 0 : i32
    return %c0_i32, %c0_i32_0 : i32, i32
  }
  func.func @transform_3(%arg0: i32) -> (i32, i32) {
    %c0_i32 = arith.constant 0 : i32
    %c0_i32_0 = arith.constant 0 : i32
    %c0_i32_1 = arith.constant 0 : i32
    return %c0_i32, %c0_i32_0 : i32, i32
  }
  func.func @transform_4(%arg0: i32) -> (i32, i32, i32) {
    %c0_i32 = arith.constant 0 : i32
    %c0_i32_0 = arith.constant 0 : i32
    %c0_i32_1 = arith.constant 0 : i32
    %c0_i32_2 = arith.constant 0 : i32
    return %c0_i32, %c0_i32_0, %c0_i32_1 : i32, i32, i32
  }
  func.func @transform_5(%arg0: i32) -> (i32, i32) {
    %c0_i32 = arith.constant 0 : i32
    %c0_i32_0 = arith.constant 0 : i32
    %c0_i32_1 = arith.constant 0 : i32
    return %c0_i32, %c0_i32_0 : i32, i32
  }
  func.func @transform_6(%arg0: i32) -> (i32, i32) {
    %c0_i32 = arith.constant 0 : i32
    %c0_i32_0 = arith.constant 0 : i32
    return %arg0, %c0_i32 : i32, i32
  }
}

</mosaic_0001>

<bundles_post_ra>
// kernel: localized_option_encoder_forward.1
= control target key start
LH: loop header
LB: loop body
LE: loop exit
PB: predicated region body
PF: predicated region fallthrough
CT: control target
= control target key end

     0   :  { %v1007_v0 = vmov 1   ;;  %v1008_v9 = vmov 5   ;;  %v1009_v13 = vmov 3   ;;  %v1010_v14 = vmov 7   ;;  %s1361_s0 = inlined_call_operand.vmem [shape: f32[16,8], index: 0, kind: input, shape index: {}]   ;;  %s1362_s4 = inlined_call_operand.vmem [shape: f32[4,128,64], index: 4, kind: input, shape index: {}]   ;;  %s1363_s3 = inlined_call_operand.vmem [shape: f32[4,128], index: 3, kind: input, shape index: {}]   ;;  %s1364_s2 = inlined_call_operand.vmem [shape: f32[4,128], index: 2, kind: input, shape index: {}]   ;;  %s1365_s1 = inlined_call_operand.vmem [shape: f32[4,128], index: 1, kind: input, shape index: {}]   ;;  %s1366_s5 = inlined_call_operand.vmem [shape: f32[4,64], index: 5, kind: input, shape index: {}]   ;;  %s1367_s6 = inlined_call_operand.vmem [shape: f32[16,256], index: 6, kind: output, shape index: {}]  }
   0x1   :  { %994 = vset.pattern.permute.xlu1 %v1007_v0  ;;  %992 = vset.pattern.permute.xlu0 %v1007_v0  ;;  %v1054_v1 = vld [vmem:[%s1361_s0 + $0x8] sm:$0xff]  ;;  %v1059_v2 = vld [vmem:[%s1361_s0] sm:$0xff]  ;;  %v597_v5 = vld [vmem:[%s1362_s4 + $0x90] sm:$0xff]  ;;  %v1011_v18 = vmov 0   ;;  %v1012_v24 = vmov 4   ;;  %v1013_v29 = vmov 2   ;;  %v39_v0 = vlaneseq }
   0x2   :  { %v595_v3 = vld [vmem:[%s1362_s4 + $0x80] sm:$0xff]  ;;  %169 = vperm.xlu1 %994, %v1054_v1   ;;  %165 = vperm.xlu0 %992, %v1059_v2   ;;  %v596_v4 = vld [vmem:[%s1362_s4 + $0x88] sm:$0xff]  ;;  %v598_v6 = vld [vmem:[%s1362_s4 + $0x98] sm:$0xff]  ;;  %v1014_v36 = vmov 6   ;;  %vm582_vm0 = vcmask 523264  }
   0x3   :  { %v887_v7 = vpack.c.bf16 %v596_v4, %v595_v3  ;;  %v891_v8 = vpack.c.bf16 %v598_v6, %v597_v5  ;;  %v599_v10 = vld [vmem:[%s1362_s4 + $0xa0] sm:$0xff]  ;;  %v600_v11 = vld [vmem:[%s1362_s4 + $0xa8] sm:$0xff]  ;;  %v601_v15 = vld [vmem:[%s1362_s4 + $0xb0] sm:$0xff] }
   0x4   :  { %v895_v12 = vpack.c.bf16 %v600_v11, %v599_v10  ;;  %v602_v16 = vld [vmem:[%s1362_s4 + $0xb8] sm:$0xff]  ;;  %v603_v19 = vld [vmem:[%s1362_s4 + $0xc0] sm:$0xff]  ;;  %v604_v20 = vld [vmem:[%s1362_s4 + $0xc8] sm:$0xff] }
   0x5   :  { %888 = vmatprep.subr.bf16.mxu1 %v887_v7  ;;  %v899_v17 = vpack.c.bf16 %v602_v16, %v601_v15  ;;  %v903_v21 = vpack.c.bf16 %v604_v20, %v603_v19  ;;  %v605_v22 = vld [vmem:[%s1362_s4 + $0xd0] sm:$0xff]  ;;  %v606_v23 = vld [vmem:[%s1362_s4 + $0xd8] sm:$0xff]  ;;  %v607_v26 = vld [vmem:[%s1362_s4 + $0xe0] sm:$0xff] }
   0x6   :  { %995 = vset.pattern.permute.xlu1 %v1008_v9  ;;  %993 = vset.pattern.permute.xlu0 %v1008_v9  ;;  %v907_v25 = vpack.c.bf16 %v606_v23, %v605_v22  ;;  %v608_v27 = vld [vmem:[%s1362_s4 + $0xe8] sm:$0xff]  ;;  %v609_v30 = vld [vmem:[%s1362_s4 + $0xf0] sm:$0xff]  ;;  %v610_v31 = vld [vmem:[%s1362_s4 + $0xf8] sm:$0xff] }
   0x7   :  { %183 = vperm.xlu1 %995, %v1054_v1   ;;  %179 = vperm.xlu0 %993, %v1059_v2   ;;  %v911_v28 = vpack.c.bf16 %v608_v27, %v607_v26  ;;  %v915_v32 = vpack.c.bf16 %v610_v31, %v609_v30  ;;  %v627_v33 = vld [vmem:[%s1362_s4 + $0x180] sm:$0xff]  ;;  %v628_v34 = vld [vmem:[%s1362_s4 + $0x188] sm:$0xff]  ;;  %v71_v39 = vld [vmem:[%s1362_s4 + $0x10] sm:$0xff] }
   0x8   :  { %890 = vmatpush3.bf16.msra.mxu1 %v887_v7  ;;  %v1128_v35 = vpack.c.bf16 %v628_v34, %v627_v33  ;;  %v69_v37 = vld [vmem:[%s1362_s4] sm:$0xff]  ;;  %v70_v38 = vld [vmem:[%s1362_s4 + $0x8] sm:$0xff]  ;;  %v72_v41 = vld [vmem:[%s1362_s4 + $0x18] sm:$0xff] }
   0x9   :  { %892 = vmatprep.subr.bf16.mxu1 %v891_v8  ;;  %v855_v40 = vpack.c.bf16 %v70_v38, %v69_v37  ;;  %v859_v42 = vpack.c.bf16 %v72_v41, %v71_v39  ;;  %v73_v43 = vld [vmem:[%s1362_s4 + $0x20] sm:$0xff]  ;;  %v74_v44 = vld [vmem:[%s1362_s4 + $0x28] sm:$0xff]  ;;  %v75_v46 = vld [vmem:[%s1362_s4 + $0x30] sm:$0xff] }
   0xa   :  { %v863_v45 = vpack.c.bf16 %v74_v44, %v73_v43  ;;  %v76_v47 = vld [vmem:[%s1362_s4 + $0x38] sm:$0xff]  ;;  %v77_v49 = vld [vmem:[%s1362_s4 + $0x40] sm:$0xff]  ;;  %v78_v50 = vld [vmem:[%s1362_s4 + $0x48] sm:$0xff] }
   0xb   :  { %996 = vset.pattern.permute.xlu1 %v1009_v13  ;;  %997 = vset.pattern.permute.xlu0 %v1010_v14  ;;  %v867_v48 = vpack.c.bf16 %v76_v47, %v75_v46  ;;  %v871_v51 = vpack.c.bf16 %v78_v50, %v77_v49  ;;  %v79_v52 = vld [vmem:[%s1362_s4 + $0x50] sm:$0xff]  ;;  %v80_v53 = vld [vmem:[%s1362_s4 + $0x58] sm:$0xff]  ;;  %v81_v55 = vld [vmem:[%s1362_s4 + $0x60] sm:$0xff] }
   0xc   :  { %433 = vperm.xlu1 %996, %v1059_v2   ;;  %447 = vperm.xlu0 %997, %v1059_v2   ;;  %v875_v54 = vpack.c.bf16 %v80_v53, %v79_v52  ;;  %v82_v56 = vld [vmem:[%s1362_s4 + $0x68] sm:$0xff]  ;;  %v83_v58 = vld [vmem:[%s1362_s4 + $0x70] sm:$0xff]  ;;  %v84_v59 = vld [vmem:[%s1362_s4 + $0x78] sm:$0xff] }
   0xd   :  { %894 = vmatpush3.bf16.msra.mxu1 %v891_v8  ;;  %856 = vmatprep.subr.bf16.mxu0 %v855_v40  ;;  %v879_v57 = vpack.c.bf16 %v82_v56, %v81_v55  ;;  %v883_v60 = vpack.c.bf16 %v84_v59, %v83_v58  ;;  %v611_v61 = vld [vmem:[%s1362_s4 + $0x100] sm:$0xff]  ;;  %v612_v62 = vld [vmem:[%s1362_s4 + $0x108] sm:$0xff]  ;;  %v633_v43 = vld [vmem:[%s1362_s4 + $0x1b0] sm:$0xff] }
   0xe   :  { %896 = vmatprep.subr.bf16.mxu1 %v895_v12  ;;  %858 = vmatpush3.bf16.msra.mxu0 %v855_v40  ;;  %v1188_v63 = vpack.c.bf16 %v612_v62, %v611_v61  ;;  %v1199_v3 = vld [vmem:[%s1363_s3] sm:$0xf]  ;;  %v632_v37 = vld [vmem:[%s1362_s4 + $0x1a8] sm:$0xff]  ;;  %v634_v44 = vld [vmem:[%s1362_s4 + $0x1b8] sm:$0xff] }
   0xf   :  { %860 = vmatprep.subr.bf16.mxu0 %v859_v42  ;;  %v1204_v4 = vld [vmem:[%s1364_s2] sm:$0xf]  ;;  %v636_v50 = vld [vmem:[%s1362_s4 + $0x1c8] sm:$0xff]  ;;  %v638_v58 = vld [vmem:[%s1362_s4 + $0x1d8] sm:$0xff] }
  0x10   :  { %437 = vperm.xlu1 %996, %v1054_v1   ;;  %999 = vset.pattern.permute.xlu0 %v1011_v18  ;;  %v1213_v9 = vld [vmem:[%s1365_s1] sm:$0xf] }
  0x11   :  { %31 = vperm.xlu0 %999, %v1059_v2   ;;  %898 = vmatpush3.bf16.msra.mxu1 %v895_v12  ;;  %v635_v49 = vld [vmem:[%s1362_s4 + $0x1c0] sm:$0xff] }
  0x12   :  { %900 = vmatprep.subr.bf16.mxu1 %v899_v17  ;;  %862 = vmatpush3.bf16.msra.mxu0 %v859_v42  ;;  %v967_v53 = vpack.c.bf16 %v636_v50, %v635_v49 }
  0x13   :  { %864 = vmatprep.subr.bf16.mxu0 %v863_v45 }
  0x14   :  { %998 = vset.pattern.permute.xlu1 %v1010_v14 }
  0x15   :  { %451 = vperm.xlu1 %998, %v1054_v1   ;;  %1002 = vset.pattern.permute.xlu0 %v1012_v24 }
  0x16   :  { %50 = vperm.xlu0 %1002, %v1054_v1   ;;  %902 = vmatpush3.bf16.msra.mxu1 %v899_v17 }
  0x17   :  { %904 = vmatprep.subr.bf16.mxu1 %v903_v21  ;;  %866 = vmatpush3.bf16.msra.mxu0 %v863_v45 }
  0x18   :  { %868 = vmatprep.subr.bf16.mxu0 %v867_v48 }
  0x19   :  { %1000 = vset.pattern.permute.xlu1 %v1012_v24  ;;  %v629_v24 = vld [vmem:[%s1362_s4 + $0x190] sm:$0xff] }
  0x1a   :  { %46 = vperm.xlu1 %1000, %v1059_v2   ;;  %906 = vmatpush3.bf16.msra.mxu1 %v903_v21 }
  0x1b   :  { %908 = vmatprep.subr.bf16.mxu1 %v907_v25  ;;  %1005 = vset.pattern.permute.xlu0 %v1013_v29 }
  0x1c   :  { %303 = vperm.xlu0 %1005, %v1054_v1   ;;  %870 = vmatpush3.bf16.msra.mxu0 %v867_v48 }
  0x1d   :  { %872 = vmatprep.subr.bf16.mxu0 %v871_v51 }
  0x1e   :  { %1001 = vset.pattern.permute.xlu1 %v1011_v18  ;;  %910 = vmatpush3.bf16.msra.mxu1 %v907_v25  ;;  %v630_v25 = vld [vmem:[%s1362_s4 + $0x198] sm:$0xff] }
  0x1f   :  { %36 = vperm.xlu1 %1001, %v1054_v1   ;;  %912 = vmatprep.subr.bf16.mxu1 %v911_v28  ;;  %v955_v33 = vpack.c.bf16 %v630_v25, %v629_v24 }
  0x20   :  { %1006 = vset.pattern.permute.xlu0 %v1010_v14  ;;  %874 = vmatpush3.bf16.msra.mxu0 %v871_v51 }
  0x21   :  { %876 = vmatprep.subr.bf16.mxu0 %v875_v54 }
  0x22   :  { %914 = vmatpush3.bf16.msra.mxu1 %v911_v28 }
  0x23   :  { %916 = vmatprep.subr.bf16.mxu1 %v915_v32  ;;  %1003 = vset.pattern.permute.xlu1 %v1013_v29 }
  0x24   :  { %299 = vperm.xlu1 %1003, %v1059_v2   ;;  %878 = vmatpush3.bf16.msra.mxu0 %v875_v54 }
  0x25   :  { %880 = vmatprep.subr.bf16.mxu0 %v879_v57 }
  0x26   :  { %918 = vmatpush3.bf16.msra.mxu1 %v915_v32 }
  0x27   :  { %952 = vmatprep.subr.bf16.mxu1 %v1128_v35 }
  0x28   :  { %1004 = vset.pattern.permute.xlu1 %v1014_v36  ;;  %882 = vmatpush3.bf16.msra.mxu0 %v879_v57  ;;  %v631_v36 = vld [vmem:[%s1362_s4 + $0x1a0] sm:$0xff]  ;;  %v637_v57 = vld [vmem:[%s1362_s4 + $0x1d0] sm:$0xff] }
  0x29   :  { %313 = vperm.xlu1 %1004, %v1059_v2   ;;  %884 = vmatprep.subr.bf16.mxu0 %v883_v60  ;;  %v959_v41 = vpack.c.bf16 %v632_v37, %v631_v36  ;;  %v971_v61 = vpack.c.bf16 %v638_v58, %v637_v57  ;;  %v618_v36 = vld [vmem:[%s1362_s4 + $0x138] sm:$0xff]  ;;  %v28_v58 = vld [vmem:[%s1366_s5] sm:$0xf] }
  0x2c   :  { %886 = vmatpush3.bf16.msra.mxu0 %v883_v60 }
  0x2d   :  { %317 = vperm.xlu1 %1004, %v1054_v1   ;;  %920 = vmatprep.subr.bf16.mxu0 %v1188_v63  ;;  %v1191_v1 = vshrl.u32 %v39_v0, 7 }
  0x2f   :  { %v1194_v2 = vsub.s32 1, %v1191_v1  ;;  %v1216_v10 = vsub.s32 3, %v1191_v1  ;;  %v1248_v40 = vsub.s32 0, %v1191_v1 }
  0x31   :  { %v175_v7 = vrot.slane %v1199_v3, %v1194_v2  ;;  %v189_v8 = vrot.slane %v1204_v4, %v1194_v2  ;;  %v197_v13 = vrot.slane %v1213_v9, %v1194_v2  ;;  %v1222_v18 = vrot.slane %v1199_v3, %v1216_v10 }
  0x32   :  { %v1226_v19 = vrot.slane %v1204_v4, %v1216_v10  ;;  %v1237_v29 = vrot.slane %v1213_v9, %v1216_v10  ;;  %v42_v45 = vrot.slane %v1199_v3, %v1248_v40  ;;  %v56_v48 = vrot.slane %v1204_v4, %v1248_v40 }
  0x33   :  { %v64_v56 = vrot.slane %v1213_v9, %v1248_v40 }
  0x81   :  { %v166_v5 = vpop.permute.xlu0 %165  ;;  %v170_v6 = vpop.permute.xlu1 %169 }
  0x82   :  { %v176_v14 = vmul.f32 %v175_v7, %v166_v5  ;;  %v177_v15 = vmul.f32 %v175_v7, %v170_v6  ;;  %v639_v5 = vld [vmem:[%s1362_s4 + $0x1e0] sm:$0xff]  ;;  %v640_v6 = vld [vmem:[%s1362_s4 + $0x1e8] sm:$0xff] }
  0x86   :  { %v184_v11 = vpop.permute.xlu1 %183  ;;  %v180_v12 = vpop.permute.xlu0 %179 }
  0x87   :  { %v191_v16 = vmul.f32 %v189_v8, %v184_v11  ;;  %v190_v17 = vmul.f32 %v189_v8, %v180_v12  ;;  %v1282_v8 = vsub.s32 2, %v1191_v1  ;;  %v641_v1 = vld [vmem:[%s1362_s4 + $0x1f0] sm:$0xff] }
  0x89   :  { %v193_v20 = vadd.f32 %v191_v16, %v177_v15  ;;  %v192_v21 = vadd.f32 %v190_v17, %v176_v14  ;;  %v975_v15 = vpack.c.bf16 %v640_v6, %v639_v5  ;;  %v613_v16 = vld [vmem:[%s1362_s4 + $0x110] sm:$0xff]  ;;  %v614_v17 = vld [vmem:[%s1362_s4 + $0x118] sm:$0xff]  ;;  %v323_v24 = vrot.slane %v1204_v4, %v1282_v8 }
  0x8b   :  { %v198_v22 = vadd.f32 %v197_v13, %v192_v21  ;;  %v199_v23 = vadd.f32 %v197_v13, %v193_v20  ;;  %v434_v26 = vpop.permute.xlu1 %433  ;;  %v448_v27 = vpop.permute.xlu0 %447  ;;  %v309_v20 = vrot.slane %v1199_v3, %v1282_v8 }
  0x8c   :  { %v444_v28 = vmul.f32 %v1222_v18, %v434_v26  ;;  %v458_v30 = vmul.f32 %v1226_v19, %v448_v27  ;;  %v615_v27 = vld [vmem:[%s1362_s4 + $0x120] sm:$0xff] }
  0x8d   :  { %v200_v31 = vmax.f32 %v198_v22, 0.0  ;;  %v201_v32 = vmax.f32 %v199_v23, 0.0  ;;  %v923_v23 = vpack.c.bf16 %v614_v17, %v613_v16 }
  0x8e   :  { %v460_v34 = vadd.f32 %v458_v30, %v444_v28  ;;  %v616_v28 = vld [vmem:[%s1362_s4 + $0x128] sm:$0xff] }
  0x8f   :  { %782 = vmatprep.mubr.f32.mxu1 %v200_v31  ;;  %v438_v38 = vpop.permute.xlu1 %437  ;;  %v927_v31 = vpack.c.bf16 %v616_v28, %v615_v27 }
  0x90   :  { %783 = vmatmul.mubr.f32.vlgmr.msra.gmra.mrb[0].mxu1 %v201_v32  ;;  %v466_v39 = vadd.f32 %v1237_v29, %v460_v34  ;;  %v32_v46 = vpop.permute.xlu0 %31  ;;  %v445_v13 = vmul.f32 %v1222_v18, %v438_v38  ;;  %v642_v18 = vld [vmem:[%s1362_s4 + $0x1f8] sm:$0xff]  ;;  %v331_v32 = vrot.slane %v1213_v9, %v1282_v8  ;;  %v617_v34 = vld [vmem:[%s1362_s4 + $0x130] sm:$0xff]  ;;  %v619_v9 = vld [vmem:[%s1362_s4 + $0x140] sm:$0xff] }
  0x91   :  { %954 = vmatpush3.bf16.msra.mxu1 %v1128_v35  ;;  %v963_v35 = vpack.c.bf16 %v634_v44, %v633_v43  ;;  %v43_v51 = vmul.f32 %v42_v45, %v32_v46  ;;  %v979_v26 = vpack.c.bf16 %v642_v18, %v641_v1  ;;  %v931_v37 = vpack.c.bf16 %v618_v36, %v617_v34  ;;  %v621_v43 = vld [vmem:[%s1362_s4 + $0x150] sm:$0xff]  ;;  %v622_v44 = vld [vmem:[%s1362_s4 + $0x158] sm:$0xff] }
  0x92   :  { %956 = vmatprep.subr.bf16.mxu1 %v955_v33  ;;  %v468_v42 = vmax.f32 %v466_v39, 0.0 }
  0x94   :  { %852 = vmatprep.mubr.f32.mxu1 %v468_v42  ;;  %v452_v47 = vpop.permute.xlu1 %451 }
  0x95   :  { %958 = vmatpush3.bf16.msra.mxu1 %v955_v33  ;;  %v51_v55 = vpop.permute.xlu0 %50  ;;  %v459_v14 = vmul.f32 %v1226_v19, %v452_v47  ;;  %v939_v47 = vpack.c.bf16 %v622_v44, %v621_v43 }
  0x96   :  { %960 = vmatprep.subr.bf16.mxu1 %v959_v41  ;;  %v58_v60 = vmul.f32 %v56_v48, %v51_v55 }
  0x97   :  { %v461_v25 = vadd.f32 %v459_v14, %v445_v13 }
  0x99   :  { %962 = vmatpush3.bf16.msra.mxu1 %v959_v41  ;;  %v47_v52 = vpop.permute.xlu1 %46  ;;  %v467_v33 = vadd.f32 %v1237_v29, %v461_v25  ;;  %v620_v29 = vld [vmem:[%s1362_s4 + $0x148] sm:$0xff] }
  0x9a   :  { %964 = vmatprep.subr.bf16.mxu1 %v963_v35  ;;  %v57_v54 = vmul.f32 %v56_v48, %v47_v52  ;;  %v935_v42 = vpack.c.bf16 %v620_v29, %v619_v9  ;;  %v624_v48 = vld [vmem:[%s1362_s4 + $0x168] sm:$0xff]  ;;  %v625_v52 = vld [vmem:[%s1362_s4 + $0x170] sm:$0xff] }
  0x9b   :  { %v469_v39 = vmax.f32 %v467_v33, 0.0  ;;  %v304_v46 = vpop.permute.xlu0 %303 }
  0x9c   :  { %v59_v59 = vadd.f32 %v57_v54, %v43_v51  ;;  %v311_v50 = vmul.f32 %v309_v20, %v304_v46 }
  0x9d   :  { %966 = vmatpush3.bf16.msra.mxu1 %v963_v35  ;;  %v623_v35 = vld [vmem:[%s1362_s4 + $0x160] sm:$0xff] }
  0x9e   :  { %968 = vmatprep.subr.bf16.mxu1 %v967_v53  ;;  %v37_v62 = vpop.permute.xlu1 %36  ;;  %v65_v0 = vadd.f32 %v64_v56, %v59_v59  ;;  %v943_v51 = vpack.c.bf16 %v624_v48, %v623_v35  ;;  %v222_v59 = vrot.slane %v28_v58, %v1194_v2  ;;  %v88_v2 = vrot.slane %v28_v58, %v1248_v40 }
  0x9f   :  { %v44_v7 = vmul.f32 %v42_v45, %v37_v62 }
  0xa0   :  { %v67_v11 = vmax.f32 %v65_v0, 0.0 }
  0xa1   :  { %970 = vmatpush3.bf16.msra.mxu1 %v967_v53  ;;  %v60_v12 = vadd.f32 %v58_v60, %v44_v7  ;;  %v626_v53 = vld [vmem:[%s1362_s4 + $0x178] sm:$0xff]  ;;  %s1015_s4 = smov 64   ;;  %v490_v7 = vrot.slane %v28_v58, %v1216_v10 }
  0xa2   :  { %972 = vmatprep.subr.bf16.mxu1 %v971_v61  ;;  %747 = vmatprep.mubr.f32.mxu0 %v67_v11  ;;  %v947_v55 = vpack.c.bf16 %v626_v53, %v625_v52 }
  0xa3   :  { %v66_v19 = vadd.f32 %v64_v56, %v60_v12  ;;  %v300_v21 = vpop.permute.xlu1 %299 }
  0xa4   :  { %v310_v3 = vmul.f32 %v309_v20, %v300_v21  ;;  %v356_v21 = vrot.slane %v28_v58, %v1282_v8 }
  0xa5   :  { %974 = vmatpush3.bf16.msra.mxu1 %v971_v61  ;;  %v68_v22 = vmax.f32 %v66_v19, 0.0 }
  0xa6   :  { %976 = vmatprep.subr.bf16.mxu1 %v975_v15 }
  0xa7   :  { %748 = vmatmul.mubr.f32.vlgmr.msra.gmra.mrb[0].mxu0 %v68_v22 }
  0xa8   :  { %922 = vmatpush3.bf16.msra.mxu0 %v1188_v63  ;;  %v314_v30 = vpop.permute.xlu1 %313 }
  0xa9   :  { %978 = vmatpush3.bf16.msra.mxu1 %v975_v15  ;;  %924 = vmatprep.subr.bf16.mxu0 %v923_v23  ;;  %v324_v4 = vmul.f32 %v323_v24, %v314_v30 }
  0xaa   :  { %980 = vmatprep.subr.bf16.mxu1 %v979_v26 }
  0xab   :  { %v326_v63 = vadd.f32 %v324_v4, %v310_v3 }
  0xac   :  { %926 = vmatpush3.bf16.msra.mxu0 %v923_v23  ;;  %v318_v45 = vpop.permute.xlu1 %317 }
  0xad   :  { %982 = vmatpush3.bf16.msra.mxu1 %v979_v26  ;;  %928 = vmatprep.subr.bf16.mxu0 %v927_v31  ;;  %v332_v38 = vadd.f32 %v331_v32, %v326_v63  ;;  %v325_v49 = vmul.f32 %v323_v24, %v318_v45 }
  0xaf   :  { %v334_v41 = vmax.f32 %v332_v38, 0.0  ;;  %v327_v54 = vadd.f32 %v325_v49, %v311_v50 }
  0xb0   :  { %853 = vmatmul.mubr.f32.vlgmr.msra.gmra.mrb[2].mxu1 %v469_v39  ;;  %930 = vmatpush3.bf16.msra.mxu0 %v927_v31 }
  0xb1   :  { %932 = vmatprep.subr.bf16.mxu0 %v931_v37  ;;  %817 = vmatprep.mubr.f32.mxu0 %v334_v41  ;;  %v333_v56 = vadd.f32 %v331_v32, %v327_v54 }
  0xb3   :  { %v335_v57 = vmax.f32 %v333_v56, 0.0 }
  0xb4   :  { %934 = vmatpush3.bf16.msra.mxu0 %v931_v37 }
  0xb5   :  { %936 = vmatprep.subr.bf16.mxu0 %v935_v42 }
  0xb8   :  { %938 = vmatpush3.bf16.msra.mxu0 %v935_v42 }
  0xb9   :  { %940 = vmatprep.subr.bf16.mxu0 %v939_v47 }
  0xbc   :  { %942 = vmatpush3.bf16.msra.mxu0 %v939_v47 }
  0xbd   :  { %944 = vmatprep.subr.bf16.mxu0 %v943_v51 }
  0xc0   :  { %946 = vmatpush3.bf16.msra.mxu0 %v943_v51 }
  0xc1   :  { %948 = vmatprep.subr.bf16.mxu0 %v947_v55 }
  0xc4   :  { %950 = vmatpush3.bf16.msra.mxu0 %v947_v55 }
  0xc7   :  { %818 = vmatmul.mubr.f32.vlgmr.msra.gmra.mrb[2].mxu0 %v335_v57 }
 0x163   :  { %v784_v60 = vpop.f32.mrb[0].mxu1 }
 0x164   :  { %v295_v61 = vadd.f32 %v784_v60, %v222_v59  ;;  %v289_v62 = vpop.f32.mrb[1].mxu1 }
 0x165   :  { %v290_v0 = vadd.f32 %v289_v62, %v222_v59 }
 0x166   :  { %570 = vrot.lane.b32.xlu0 %v295_v61, %s1015_s4 }
 0x167   :  { %568 = vrot.lane.b32.xlu1 %v290_v0, %s1015_s4 }
 0x17a   :  { %v749_v5 = vpop.f32.mrb[0].mxu0 }
 0x17b   :  { %v155_v6 = vpop.f32.mrb[1].mxu0  ;;  %v161_v17 = vadd.f32 %v749_v5, %v88_v2 }
 0x17c   :  { %v156_v1 = vadd.f32 %v155_v6, %v88_v2 }
 0x183   :  { %v854_v11 = vpop.f32.mrb[2].mxu1 }
 0x184   :  { %v563_v12 = vadd.f32 %v854_v11, %v490_v7  ;;  %v557_v13 = vpop.f32.mrb[3].mxu1 }
 0x185   :  { %v558_v14 = vadd.f32 %v557_v13, %v490_v7 }
 0x186   :  { %578 = vrot.lane.b32.xlu0 %v563_v12, %s1015_s4 }
 0x187   :  { %576 = vrot.lane.b32.xlu1 %v558_v14, %s1015_s4 }
 0x19a   :  { %v819_v15 = vpop.f32.mrb[2].mxu0 }
 0x19b   :  { %v423_v16 = vpop.f32.mrb[3].mxu0  ;;  %v429_v22 = vadd.f32 %v819_v15, %v356_v21 }
 0x19c   :  { %v424_v23 = vadd.f32 %v423_v16, %v356_v21 }
 0x1d8   :  { %v571_v18 = vpop.permute.xlu0 %570 }
 0x1d9   :  { %v584_v19 = vsel %vm582_vm0, %v161_v17, %v571_v18  ;;  %v569_v20 = vpop.permute.xlu1 %568 }
 0x1da   :  { %589 = vst [vmem:[%s1367_s6 + $0x10] sm:$0xff] %v584_v19  ;;  %v583_v10 = vsel %vm582_vm0, %v156_v1, %v569_v20 }
 0x1db   :  { %587 = vst [vmem:[%s1367_s6] sm:$0xff] %v583_v10 }
 0x1f8   :  { %v579_v40 = vpop.permute.xlu0 %578 }
 0x1f9   :  { %v586_v24 = vsel %vm582_vm0, %v429_v22, %v579_v40  ;;  %v577_v25 = vpop.permute.xlu1 %576 }
 0x1fa   :  { %590 = vst [vmem:[%s1367_s6 + $0x18] sm:$0xff] %v586_v24  ;;  %v585_v26 = vsel %vm582_vm0, %v424_v23, %v577_v25 }
 0x1fb   :  { %588 = vst [vmem:[%s1367_s6 + $0x8] sm:$0xff] %v585_v26 }

</bundles_post_ra>
